<compile_context>
chip_gen: v6e
topology: v6e:2x2x1
jax: 0.10.0
libtpu: 0.0.40
codegen_flags: <defaults>
</compile_context>

<pallas_src>
import numpy as np
import jax
import jax.numpy as jnp
from jax.experimental import pallas as pl
from jax.experimental.pallas import tpu as pltpu


_TARGET_BLOCK_BYTES = 2 * 1024 * 1024   # padded VMEM bytes per (rows, tp) block
_MIN_TOTAL_GRID_STEPS = 8               # keep the DMA pipeline busy; >= 2 feeds both v7x TCs
_SUBLANES = 8
_LANES = 128


def _round_up(x, m):
    return (x + m - 1) // m * m


def _cdiv(a, b):
    return (a + b - 1) // b


def _conv1x1_kernel(w_ref, x_ref, o_ref):
    """VPU channel mix: o = W_bd @ x as a sum of column-scaled row broadcasts.

    w_ref:        (R, R) (block-diagonal) weight, resident in VMEM.
    x_ref/o_ref:  (R, TP) tile — channels on sublanes, pixels on lanes (lane-dense).

    The contraction dim R is tiny (<= 8 here), so instead of the MXU we do an
    unrolled whole-tile multiply-accumulate on the VPU; it stays under the HBM
    roofline on v5e/v6e and ~at it on v7x.
    """
    x = x_ref[...]
    w = w_ref[...]
    r, tp = x.shape
    acc = w[:, 0:1] * jnp.broadcast_to(x[0:1, :], (r, tp))
    for j in range(1, r):
        acc = acc + w[:, j:j + 1] * jnp.broadcast_to(x[j:j + 1, :], (r, tp))
    o_ref[...] = acc.astype(o_ref.dtype)


def _pick_pixel_tile(rows, m, itemsize, n_batch_blocks):
    """Lane tile tp for the pixel axis: padding-aware VMEM cap + pipeline cap."""
    if m <= _LANES:
        return m                                   # full-extent block (always legal)
    rows_pad = _round_up(rows, _SUBLANES)          # real sublane footprint in VMEM
    tp_vmem = max(
        _LANES, (_TARGET_BLOCK_BYTES // (rows_pad * itemsize)) // _LANES * _LANES
    )
    # Enough grid steps to hide compute behind DMA and to feed both v7x cores.
    steps_pix = max(1, _cdiv(_MIN_TOTAL_GRID_STEPS, n_batch_blocks))
    tp_steps = max(_LANES, _round_up(_cdiv(m, steps_pix), _LANES))
    return min(tp_vmem, tp_steps, _round_up(m, _LANES))


def _conv1x1_pallas(w_bd, x3):
    """w_bd: (R, R) block-diag weight f32, x3: (NB, R, M) f32 -> (NB, R, M)."""
    NB, R, M = x3.shape
    itemsize = jnp.dtype(x3.dtype).itemsize
    tp = _pick_pixel_tile(R, M, itemsize, NB)
    grid = (NB, _cdiv(M, tp))

    cost = pl.CostEstimate(
        flops=2 * R * R * NB * M,    # upper bound (block-diag: half are trivial)
        transcendentals=0,
        bytes_accessed=(2 * NB * R * M + R * R) * itemsize,
    )

    return pl.pallas_call(
        _conv1x1_kernel,
        out_shape=jax.ShapeDtypeStruct((NB, R, M), x3.dtype),
        grid_spec=pltpu.PrefetchScalarGridSpec(
            num_scalar_prefetch=0,
            grid=grid,
            in_specs=[
                # Tiny weight, resident in VMEM across the whole grid.
                pl.BlockSpec((R, R), lambda n, i: (0, 0)),
                # One packed-sample block (squeezed batch dim), tp-wide pixel tile.
                pl.BlockSpec((pl.Squeezed(), R, tp), lambda n, i: (n, 0, i)),
            ],
            out_specs=pl.BlockSpec((pl.Squeezed(), R, tp), lambda n, i: (n, 0, i)),
        ),
        compiler_params=pltpu.CompilerParams(
            dimension_semantics=("parallel", "parallel"),
        ),
        cost_estimate=cost,
    )(w_bd, x3)


def invertible_1x1_conv(x, weight, logdet=None, reverse=False):
    """Forward pass matching Invertible1x1Conv.forward.

    x: (N, C, H, W) float32 (NCHW, same as PyTorch), weight: (C, C) float32.
    Returns (z, logdet) with z in NCHW.
    """
    N, C, H, W = x.shape
    M = H * W
    logdet_factor = M                       # ops.count_pixels(x)
    _, logabsdet = jnp.linalg.slogdet(weight)
    dlogdet = logabsdet * logdet_factor

    if reverse:
        # TODO(synk): for a trained, possibly ill-conditioned W prefer solving
        # W z = x (or a higher-precision inverse); QR-init W is orthogonal so
        # a plain f32 inverse is fine here.
        w_eff = jnp.linalg.inv(weight)
    else:
        w_eff = weight

    # Pack P samples per block so the 8 f32 sublanes of every vreg / VMEM tile
    # are filled (C=4 alone wastes half).  Reshape is free: NCHW is contiguous.
    P = 1
    if C < _SUBLANES and _SUBLANES % C == 0 and N % (_SUBLANES // C) == 0:
        P = _SUBLANES // C
    R = P * C

    # Block-diagonal weight: same CxC mix for every packed sample; off-diagonal
    # quadrants are exactly zero so packed samples cannot leak into each other.
    w_bd = jnp.kron(jnp.eye(P, dtype=w_eff.dtype), w_eff) if P > 1 else w_eff

    x3 = x.reshape(N // P, R, M)            # free, contiguous reshape — no transposes
    z3 = _conv1x1_pallas(w_bd, x3)
    z = z3.reshape(N, C, H, W)

    if logdet is not None:
        logdet = logdet - dlogdet if reverse else logdet + dlogdet
    return z, logdet


if __name__ == "__main__":
    # Deterministic parameter init (same recipe as the module: QR of a gaussian).
    num_channels = 4
    rng = np.random.RandomState(0)
    w_init = np.linalg.qr(rng.randn(num_channels, num_channels))[0].astype("float32")
    weight = jnp.asarray(w_init)

    # Deterministic input, NCHW like PyTorch conv2d.
    key = jax.random.PRNGKey(0)
    x = jax.random.normal(key, (2, num_channels, 16, 16), dtype=jnp.float32)
    logdet0 = jnp.zeros((2,), dtype=jnp.float32)

    # Forward (packed path: 2 samples per block, R = 8).
    z, logdet = invertible_1x1_conv(x, weight, logdet=logdet0, reverse=False)
    z = jax.block_until_ready(z)
    logdet = jax.block_until_ready(logdet)

    # Reference check in plain JAX (1x1 conv == channel matmul).
    z_ref = jnp.einsum("oc,nchw->nohw", weight, x)
    _, lad = jnp.linalg.slogdet(weight)
    logdet_ref = logdet0 + lad * (16 * 16)
    assert jnp.allclose(z, z_ref, atol=1e-5), "mismatch vs reference conv"
    assert jnp.allclose(logdet, logdet_ref, atol=1e-5), "mismatch vs reference logdet"

    # Reverse path reconstructs the input (W is orthogonal from QR init).
    x_rec, logdet_rt = invertible_1x1_conv(z, weight, logdet=logdet, reverse=True)
    x_rec = jax.block_until_ready(x_rec)
    assert jnp.allclose(x_rec, x, atol=1e-4), "reverse pass does not invert forward"
    assert jnp.allclose(logdet_rt, logdet0, atol=1e-3), "logdet round-trip mismatch"

    # Odd / unpackable batch exercises the P == 1 fallback path.
    x1 = jax.random.normal(jax.random.PRNGKey(1), (1, num_channels, 8, 8),
                           dtype=jnp.float32)
    z1, _ = invertible_1x1_conv(x1, weight, logdet=None, reverse=False)
    z1 = jax.block_until_ready(z1)
    z1_ref = jnp.einsum("oc,nchw->nohw", weight, x1)
    assert jnp.allclose(z1, z1_ref, atol=1e-5), "mismatch vs reference conv (P=1 path)"

    print("KERNEL_OK")
</pallas_src>

<mosaic_0001>
module attributes {stable_mosaic.version = 11 : i64} {
  func.func @_conv1x1_kernel(%arg0: i32, %arg1: i32, %arg2: memref<8x8xf32, #tpu.memory_space<vmem>>, %arg3: memref<1x8x128xf32, #tpu.memory_space<vmem>>, %arg4: memref<1x8x128xf32, #tpu.memory_space<vmem>>) attributes {dimension_semantics = [#tpu.dimension_semantics<parallel>, #tpu.dimension_semantics<parallel>], iteration_bounds = array<i64: 1, 2>, scalar_prefetch = 0 : i64, scratch_operands = 0 : i64, tpu.core_type = #tpu.core_type<tc>, window_params = [{pipeline_mode = #tpu.pipeline_mode<synchronous>, transform_indices = @transform_0, window_bounds = array<i64: 8, 8>}, {transform_indices = @transform_1, window_bounds = array<i64: 1, 8, 128>}, {transform_indices = @transform_2, window_bounds = array<i64: 1, 8, 128>}]} {
    %c0 = arith.constant 0 : index
    %c0_0 = arith.constant 0 : index
    %c0_1 = arith.constant 0 : index
    %0 = vector.load %arg3[%c0, %c0_0, %c0_1] : memref<1x8x128xf32, #tpu.memory_space<vmem>>, vector<1x8x128xf32>
    %1 = vector.shape_cast %0 : vector<1x8x128xf32> to vector<8x128xf32>
    %c0_2 = arith.constant 0 : index
    %c0_3 = arith.constant 0 : index
    %2 = vector.load %arg2[%c0_2, %c0_3] : memref<8x8xf32, #tpu.memory_space<vmem>>, vector<8x8xf32>
    %3 = vector.extract_strided_slice %2 {offsets = [0, 0], sizes = [8, 1], strides = [1, 1]} : vector<8x8xf32> to vector<8x1xf32>
    %4 = vector.extract_strided_slice %1 {offsets = [0, 0], sizes = [1, 128], strides = [1, 1]} : vector<8x128xf32> to vector<1x128xf32>
    %5 = vector.shape_cast %4 : vector<1x128xf32> to vector<1x128xf32>
    %6 = vector.broadcast %5 : vector<1x128xf32> to vector<8x128xf32>
    %7 = vector.broadcast %3 : vector<8x1xf32> to vector<8x128xf32>
    %8 = arith.mulf %7, %6 : vector<8x128xf32>
    %9 = vector.extract_strided_slice %2 {offsets = [0, 1], sizes = [8, 1], strides = [1, 1]} : vector<8x8xf32> to vector<8x1xf32>
    %10 = vector.extract_strided_slice %1 {offsets = [1, 0], sizes = [1, 128], strides = [1, 1]} : vector<8x128xf32> to vector<1x128xf32>
    %11 = vector.shape_cast %10 : vector<1x128xf32> to vector<1x128xf32>
    %12 = vector.broadcast %11 : vector<1x128xf32> to vector<8x128xf32>
    %13 = vector.broadcast %9 : vector<8x1xf32> to vector<8x128xf32>
    %14 = arith.mulf %13, %12 : vector<8x128xf32>
    %15 = arith.addf %8, %14 : vector<8x128xf32>
    %16 = vector.extract_strided_slice %2 {offsets = [0, 2], sizes = [8, 1], strides = [1, 1]} : vector<8x8xf32> to vector<8x1xf32>
    %17 = vector.extract_strided_slice %1 {offsets = [2, 0], sizes = [1, 128], strides = [1, 1]} : vector<8x128xf32> to vector<1x128xf32>
    %18 = vector.shape_cast %17 : vector<1x128xf32> to vector<1x128xf32>
    %19 = vector.broadcast %18 : vector<1x128xf32> to vector<8x128xf32>
    %20 = vector.broadcast %16 : vector<8x1xf32> to vector<8x128xf32>
    %21 = arith.mulf %20, %19 : vector<8x128xf32>
    %22 = arith.addf %15, %21 : vector<8x128xf32>
    %23 = vector.extract_strided_slice %2 {offsets = [0, 3], sizes = [8, 1], strides = [1, 1]} : vector<8x8xf32> to vector<8x1xf32>
    %24 = vector.extract_strided_slice %1 {offsets = [3, 0], sizes = [1, 128], strides = [1, 1]} : vector<8x128xf32> to vector<1x128xf32>
    %25 = vector.shape_cast %24 : vector<1x128xf32> to vector<1x128xf32>
    %26 = vector.broadcast %25 : vector<1x128xf32> to vector<8x128xf32>
    %27 = vector.broadcast %23 : vector<8x1xf32> to vector<8x128xf32>
    %28 = arith.mulf %27, %26 : vector<8x128xf32>
    %29 = arith.addf %22, %28 : vector<8x128xf32>
    %30 = vector.extract_strided_slice %2 {offsets = [0, 4], sizes = [8, 1], strides = [1, 1]} : vector<8x8xf32> to vector<8x1xf32>
    %31 = vector.extract_strided_slice %1 {offsets = [4, 0], sizes = [1, 128], strides = [1, 1]} : vector<8x128xf32> to vector<1x128xf32>
    %32 = vector.shape_cast %31 : vector<1x128xf32> to vector<1x128xf32>
    %33 = vector.broadcast %32 : vector<1x128xf32> to vector<8x128xf32>
    %34 = vector.broadcast %30 : vector<8x1xf32> to vector<8x128xf32>
    %35 = arith.mulf %34, %33 : vector<8x128xf32>
    %36 = arith.addf %29, %35 : vector<8x128xf32>
    %37 = vector.extract_strided_slice %2 {offsets = [0, 5], sizes = [8, 1], strides = [1, 1]} : vector<8x8xf32> to vector<8x1xf32>
    %38 = vector.extract_strided_slice %1 {offsets = [5, 0], sizes = [1, 128], strides = [1, 1]} : vector<8x128xf32> to vector<1x128xf32>
    %39 = vector.shape_cast %38 : vector<1x128xf32> to vector<1x128xf32>
    %40 = vector.broadcast %39 : vector<1x128xf32> to vector<8x128xf32>
    %41 = vector.broadcast %37 : vector<8x1xf32> to vector<8x128xf32>
    %42 = arith.mulf %41, %40 : vector<8x128xf32>
    %43 = arith.addf %36, %42 : vector<8x128xf32>
    %44 = vector.extract_strided_slice %2 {offsets = [0, 6], sizes = [8, 1], strides = [1, 1]} : vector<8x8xf32> to vector<8x1xf32>
    %45 = vector.extract_strided_slice %1 {offsets = [6, 0], sizes = [1, 128], strides = [1, 1]} : vector<8x128xf32> to vector<1x128xf32>
    %46 = vector.shape_cast %45 : vector<1x128xf32> to vector<1x128xf32>
    %47 = vector.broadcast %46 : vector<1x128xf32> to vector<8x128xf32>
    %48 = vector.broadcast %44 : vector<8x1xf32> to vector<8x128xf32>
    %49 = arith.mulf %48, %47 : vector<8x128xf32>
    %50 = arith.addf %43, %49 : vector<8x128xf32>
    %51 = vector.extract_strided_slice %2 {offsets = [0, 7], sizes = [8, 1], strides = [1, 1]} : vector<8x8xf32> to vector<8x1xf32>
    %52 = vector.extract_strided_slice %1 {offsets = [7, 0], sizes = [1, 128], strides = [1, 1]} : vector<8x128xf32> to vector<1x128xf32>
    %53 = vector.shape_cast %52 : vector<1x128xf32> to vector<1x128xf32>
    %54 = vector.broadcast %53 : vector<1x128xf32> to vector<8x128xf32>
    %55 = vector.broadcast %51 : vector<8x1xf32> to vector<8x128xf32>
    %56 = arith.mulf %55, %54 : vector<8x128xf32>
    %57 = arith.addf %50, %56 : vector<8x128xf32>
    %c0_4 = arith.constant 0 : index
    %c0_5 = arith.constant 0 : index
    %c0_6 = arith.constant 0 : index
    %58 = vector.load %arg4[%c0_4, %c0_5, %c0_6] : memref<1x8x128xf32, #tpu.memory_space<vmem>>, vector<1x8x128xf32>
    %59 = vector.shape_cast %58 : vector<1x8x128xf32> to vector<8x128xf32>
    %60 = vector.shape_cast %57 : vector<8x128xf32> to vector<1x8x128xf32>
    tpu.vector_store %arg4[%c0_4, %c0_5, %c0_6], %60 {strides = array<i32>} : memref<1x8x128xf32, #tpu.memory_space<vmem>>, vector<1x8x128xf32>,
    return
  }
  func.func @transform_0(%arg0: i32, %arg1: i32) -> (i32, i32) {
    %c0_i32 = arith.constant 0 : i32
    %c0_i32_0 = arith.constant 0 : i32
    %c0_i32_1 = arith.constant 0 : i32
    return %c0_i32, %c0_i32_0 : i32, i32
  }
  func.func @transform_1(%arg0: i32, %arg1: i32) -> (i32, i32, i32) {
    %c0_i32 = arith.constant 0 : i32
    %c0_i32_0 = arith.constant 0 : i32
    return %arg0, %c0_i32, %arg1 : i32, i32, i32
  }
  func.func @transform_2(%arg0: i32, %arg1: i32) -> (i32, i32, i32) {
    %c0_i32 = arith.constant 0 : i32
    %c0_i32_0 = arith.constant 0 : i32
    return %arg0, %c0_i32, %arg1 : i32, i32, i32
  }
}

</mosaic_0001>

<bundles_post_ra>
// kernel: tpu_custom_call.1
= control target key start
LH: loop header
LB: loop body
LE: loop exit
PB: predicated region body
PF: predicated region fallthrough
CT: control target
= control target key end

     0   :  { %7 = vsyncpa [#allocation3], 0  ;;  %s822_s0 = inlined_call_operand.hbm [shape: f32[8,8], index: 0, kind: input, shape index: {}]   ;;  %s823_s1 = inlined_call_operand.hbm [shape: f32[1,8,256], index: 1, kind: input, shape index: {}]   ;;  %s824_s2 = inlined_call_operand.hbm [shape: f32[1,8,256], index: 2, kind: output, shape index: {}]  }
   0x1   :  { %8 = vsyncpa [#allocation6], 0 }
   0x2   :  { %10 = vsyncpa [#allocation6 + $0x1], 0 }
   0x3   :  { %11 = vsyncpa [#allocation4], 0 }
   0x4   :  { %13 = vsyncpa [#allocation4 + $0x1], 0  ;;  %s654_s9 = smov 0   ;;  %s656_s10 = smov 0  }
   0x5   :  { %s658_s11 = smov 0   ;;  %s660_s12 = smov 0  }
   0x6   :  { %s662_s13 = smov 0   ;;  %s664_s14 = smov 0  }
   0x7 LB: > { %s383_s15 = sadd.s32 4294967295, %s626_s14   ;;  %s384_s16 = sadd.s32 4294967294, %s626_s14   ;;  %s626_s14 = sphi %s664_s14, %s19_s14   ;;  %s622_s13 = sphi %s662_s13, %s841_s13   ;;  %s618_s12 = sphi %s660_s12, %s840_s12   ;;  %s614_s11 = sphi %s658_s11, %s839_s11   ;;  %s610_s10 = sphi %s656_s10, %s838_s10   ;;  %s606_s9 = sphi %s654_s9, %s837_s9  }
   0x8   : > { %p74_p0 = scmp.ne.s32.totalorder %s610_s10, %s606_s9  ;;  %p688_p1 = scmp.eq.s32.totalorder %s383_s15, 0 }
   0x9   : > { %p692_p2 = scmp.eq.s32.totalorder %s383_s15, 1  ;;  %p106_p3 = scmp.eq.s32.totalorder %s384_s16, 1 }
   0xa   : > { %p698_p4 = por %p688_p1, %p74_p0  ;;  %p385_p5 = scmp.ge.s32.totalorder %s626_s14, 1 }
   0xb   : > { %p703_p6 = por %p106_p3, %p74_p0  ;;  %p113_p7 = scmp.lt.s32.totalorder %s626_s14, 3 }
   0xc   : > { %s828_s19 = scalar_select %p698_p4, 1, 0 }
   0xd   : > { %s829_s20 = scalar_select %p703_p6, 1, 0 }
   0xe   : > { %p708_p8 = pnand %p385_p5, %p113_p7  ;;  %s628_s22 = smov [#allocation2]  }
   0xf   : > { %s126_s23 = sshll.u32 %s628_s22, 4  ;;  %s28_s25 = sadd.s32 1, %s622_s13  ;;  %s127_s23 = int_to_ptr.vmem [resolvable:$true] %s126_s23 }
  0x10   : > { %p406_p10 = pneg %p708_p8  ;;  %s61_s26 = sadd.s32 1, %s614_s11 }
  0x11   : > { %p29_p12 = scmp.ge.s32.totalorder %s28_s25, 2  ;;  %s499_s27 = scalar_lea.vmem %s127_s23, 128 }
  0x12   : > { %p717_p11 = pnand %p406_p10, %p688_p1  ;;  %p500_p0 = scmp.ne.s32.totalorder %s127_s23, %s499_s27 }
  0x13   : > { %p507_p7 = scmp.lt.s32.totalorder %s127_s23, %s127_s23  ;;  %p508_p6 = scmp.lt.s32.totalorder %s499_s27, %s499_s27 }
  0x14   : > { %p490_p13 = pneg %p717_p11 }
  0x15   : > { %p509_p9 = por %p508_p6, %p507_p7 }
  0x16   : > { %p502_p3 = pnand %p500_p0, %p490_p13 }
  0x18   : > { %p503_p5 = pneg %p502_p3 }
  0x1a   : > { %p510_p4 = pnand %p509_p9, %p503_p5 }
  0x1c   : > { %513 = shalt.err (!%p510_p4)
}
  0x1d   : > { %409 = dma.hbm_to_vmem [thread:$0]  (!%p717_p11), %s822_s0, 128, %s127_s23, [#allocation3]  }
  0x1e   : > { %s843_s25 = smov (%p29_p12, %s28_s25), 0  ;;  %p68_p6 = scmp.ne.s32.totalorder %s614_s11, %s610_s10 }
  0x1f   : > { %p69_p4 = scmp.eq.s32.totalorder %s626_s14, 0  ;;  %s57_s30 = ssub.s32 %s622_s13, %s843_s25 }
  0x20   : > { %p419_p9 = scmp.lt.s32.totalorder %s626_s14, 2  ;;  %p59_p10 = scmp.eq.s32.totalorder %s57_s30, 0 }
  0x21   : > { %p70_p13 = por %p69_p4, %p68_p6  ;;  %p740_p0 = por %p692_p2, %p68_p6 }
  0x22   : > { %s137_s4 = sand.u32 1, %s614_s11   ;;  %s389_s7 = sshll.u32 %s622_s13, 7 }
  0x23   : > { %s746_s5 = scalar_select %p59_p10, %s614_s11, %s61_s26  }
  0x24   : > { %s388_s6 = sshll.u32 %s137_s4, 3  ;;  %s148_s16 = scalar_lea.hbm %s823_s1, %s389_s7 }
  0x25   : > { %s141_s22 = scalar_lea.vmem [#allocation5], %s388_s6  ;;  %p752_p11 = pnand %p419_p9, %p70_p13 }
  0x26   : > { %s150_s23 = sshll.u32 %s141_s22, 4  ;;  %s138_s18 = scalar_lea.sflag [#allocation6], %s137_s4  ;;  %s151_s23 = int_to_ptr.vmem [resolvable:$true] %s150_s23 }
  0x27   : > { %p516_p2 = pneg %p752_p11  ;;  %s527_s27 = scalar_lea.vmem %s151_s23, 128 }
  0x28   : > { %p528_p12 = scmp.ne.s32.totalorder %s151_s23, %s527_s27  ;;  %s629_s26 = smov [#allocation5]  }
  0x29   : > { %s532_s28 = sshll.u32 %s629_s26, 4  ;;  %s533_s28 = int_to_ptr.vmem [resolvable:$false] %s532_s28 }
  0x2a   : > { %p530_p3 = pnand %p528_p12, %p516_p2  ;;  %s534_s29 = scalar_lea.vmem %s533_s28, 256 }
  0x2b   : > { %p535_p7 = scmp.lt.s32.totalorder %s151_s23, %s533_s28  ;;  %p536_p6 = scmp.lt.s32.totalorder %s534_s29, %s527_s27 }
  0x2c   : > { %p531_p5 = pneg %p530_p3 }
  0x2d   : > { %p537_p4 = por %p536_p6, %p535_p7 }
  0x2f   : > { %p538_p10 = pnand %p537_p4, %p531_p5 }
  0x31   : > { %541 = shalt.err (!%p538_p10)
}
  0x32   : > { %413 = dma.hbm_to_vmem [thread:$0]  (!%p752_p11), %s148_s16, 128, %s151_s23, %s138_s18  }
  0x33   : > { %159 = sbr.rel (%p708_p8) target bundleno = 224 (0xe0), region = 28 }
  0x38   : > { %593 = dma.done.wait (%p688_p1), [#allocation3], 128  }
  0x39   : > { %595 = vsyncadd (%p688_p1), [#allocation3], 4294967168  ;;  %s767_s30 = sand.u32 1, %s610_s10   ;;  %p834_p9 = scmp.ne.s32.totalorder %s828_s19, 0 }
  0x3a   : > { %s392_s4 = sshll.u32 %s767_s30, 3  ;;  %s166_s6 = scalar_lea.sflag [#allocation6], %s767_s30 }
  0x3b   : > { %s773_s7 = scalar_lea.vmem [#allocation5], %s392_s4 }
  0x3c   : > { %597 = dma.done.wait (%p834_p9), %s166_s6, 128  }
  0x3d   : > { %599 = vsyncadd (%p834_p9), %s166_s6, 4294967168  ;;  %v630_v0 = vmov 2   ;;  %v631_v1 = vmov 0   ;;  %v191_v2 = vld [vmem:[#allocation2] sm:$0xff]  ;;  %v632_v3 = vmov 3   ;;  %v633_v4 = vmov 1  }
  0x3e   : > { %481 = vset.pattern.permute.xlu1 %v630_v0  ;;  %479 = vset.pattern.permute.xlu0 %v631_v1  ;;  %v634_v5 = vmov 4   ;;  %v635_v6 = vmov 5   ;;  %v636_v7 = vmov 6   ;;  %v637_v8 = vmov 7   ;;  %v190_v16 = vld [vmem:[%s773_s7] sm:$0xff]  ;;  %s395_s17 = sshll.u32 %s618_s12, 7 }
  0x3f   : > { %217 = vperm.xlu1 %481, %v191_v2   ;;  %198 = vperm.xlu0 %479, %v191_v2   ;;  %v192_v9 = vlaneseq  ;;  %s189_s19 = scalar_lea.vmem [#allocation7], %s392_s4  ;;  %s287_s16 = scalar_lea.hbm %s824_s2, %s395_s17 }
  0x40   : > { %s289_s21 = sshll.u32 %s189_s19, 4  ;;  %s274_s22 = scalar_lea.sflag [#allocation4], %s767_s30  ;;  %s290_s21 = int_to_ptr.vmem [resolvable:$true] %s289_s21 }
  0x41   : > { %v193_v10 = vshrl.u32 %v192_v9, 7  ;;  %s542_s23 = scalar_lea.vmem %s290_s21, 128  ;;  %s638_s24 = smov [#allocation7]  }
  0x42   : > { %p543_p1 = scmp.ne.s32.totalorder %s290_s21, %s542_s23  ;;  %s546_s12 = sshll.u32 %s638_s24, 4  ;;  %s547_s12 = int_to_ptr.vmem [resolvable:$false] %s546_s12 }
  0x43   : > { %482 = vset.pattern.permute.xlu1 %v632_v3  ;;  %480 = vset.pattern.permute.xlu0 %v633_v4  ;;  %v194_v11 = vsub.s32 0, %v193_v10  ;;  %v204_v12 = vsub.s32 1, %v193_v10  ;;  %v214_v13 = vsub.s32 2, %v193_v10  ;;  %v224_v18 = vsub.s32 3, %v193_v10  ;;  %s548_s18 = scalar_lea.vmem %s547_s12, 256  ;;  %p549_p11 = scmp.lt.s32.totalorder %s290_s21, %s547_s12 }
  0x44   : > { %227 = vperm.xlu1 %482, %v191_v2   ;;  %207 = vperm.xlu0 %480, %v191_v2   ;;  %v234_v20 = vsub.s32 4, %v193_v10  ;;  %v244_v24 = vsub.s32 5, %v193_v10  ;;  %v254_v32 = vsub.s32 6, %v193_v10  ;;  %v264_v41 = vsub.s32 7, %v193_v10  ;;  %p544_p8 = pnand %p543_p1, %p740_p0  ;;  %p550_p2 = scmp.lt.s32.totalorder %s548_s18, %s542_s23 }
  0x45   : > { %v195_v17 = vrot.slane %v190_v16, %v194_v11  ;;  %v205_v19 = vrot.slane %v190_v16, %v204_v12  ;;  %v215_v21 = vrot.slane %v190_v16, %v214_v13  ;;  %v225_v26 = vrot.slane %v190_v16, %v224_v18 }
  0x46   : > { %v235_v28 = vrot.slane %v190_v16, %v234_v20  ;;  %v245_v31 = vrot.slane %v190_v16, %v244_v24  ;;  %v255_v40 = vrot.slane %v190_v16, %v254_v32  ;;  %v265_v46 = vrot.slane %v190_v16, %v264_v41  ;;  %p545_p13 = pneg %p544_p8  ;;  %p551_p12 = por %p550_p2, %p549_p11 }
  0x48   : > { %483 = vset.pattern.permute.xlu1 %v634_v5  ;;  %484 = vset.pattern.permute.xlu0 %v635_v6  ;;  %p552_p3 = pnand %p551_p12, %p545_p13 }
  0x49   : > { %237 = vperm.xlu1 %483, %v191_v2   ;;  %247 = vperm.xlu0 %484, %v191_v2  }
  0x4d   : > { %485 = vset.pattern.permute.xlu1 %v636_v7  ;;  %487 = vset.pattern.permute.xlu0 %v637_v8 }
  0x4e   : > { %257 = vperm.xlu1 %485, %v191_v2  }
  0x52   : > { %486 = vset.pattern.permute.xlu1 %v637_v8 }
  0x53   : > { %267 = vperm.xlu1 %486, %v191_v2  }
  0xba   : > { %v218_v14 = vpop.permute.xlu1 %217  ;;  %v199_v15 = vpop.permute.xlu0 %198 }
  0xbb   : > { %v201_v25 = vmul.f32 %v199_v15, %v195_v17  ;;  %v220_v29 = vmul.f32 %v218_v14, %v215_v21 }
  0xbf   : > { %v228_v22 = vpop.permute.xlu1 %227  ;;  %v208_v23 = vpop.permute.xlu0 %207 }
  0xc0   : > { %v210_v27 = vmul.f32 %v208_v23, %v205_v19  ;;  %v230_v33 = vmul.f32 %v228_v22, %v225_v26 }
  0xc2   : > { %v211_v30 = vadd.f32 %v210_v27, %v201_v25 }
  0xc4   : > { %v221_v34 = vadd.f32 %v220_v29, %v211_v30  ;;  %v238_v35 = vpop.permute.xlu1 %237  ;;  %v248_v36 = vpop.permute.xlu0 %247 }
  0xc5   : > { %v240_v37 = vmul.f32 %v238_v35, %v235_v28  ;;  %v250_v39 = vmul.f32 %v248_v36, %v245_v31 }
  0xc6   : > { %v231_v38 = vadd.f32 %v230_v33, %v221_v34 }
  0xc8   : > { %v241_v42 = vadd.f32 %v240_v37, %v231_v38 }
  0xc9   : > { %v258_v43 = vpop.permute.xlu1 %257 }
  0xca   : > { %v251_v44 = vadd.f32 %v250_v39, %v241_v42  ;;  %v260_v45 = vmul.f32 %v258_v43, %v255_v40 }
  0xcc   : > { %v261_v48 = vadd.f32 %v260_v45, %v251_v44 }
  0xce   : > { %v268_v47 = vpop.permute.xlu1 %267 }
  0xcf   : > { %v270_v49 = vmul.f32 %v268_v47, %v265_v46 }
  0xd1   : > { %v271_v50 = vadd.f32 %v270_v49, %v261_v48 }
  0xd3   : > { %272 = vst [vmem:[%s189_s19] sm:$0xff] %v271_v50 }
  0xd4   : > { %555 = shalt.err (!%p552_p3)
}
  0xd5   : > { %s556_s27 = scalar_lea.hbm %s287_s16, 128  ;;  %s560_s29 = scalar_lea.hbm %s824_s2, 256 }
  0xd6   : > { %p557_p5 = scmp.ne.s32.totalorder %s287_s16, %s556_s27  ;;  %p561_p4 = scmp.lt.s32.totalorder %s287_s16, %s824_s2 }
  0xd7   : > { %p562_p10 = scmp.lt.s32.totalorder %s560_s29, %s556_s27 }
  0xd8   : > { %p558_p7 = pnand %p557_p5, %p740_p0 }
  0xd9   : > { %p563_p9 = por %p562_p10, %p561_p4 }
  0xda   : > { %p559_p6 = pneg %p558_p7 }
  0xdc   : > { %p564_p1 = pnand %p563_p9, %p559_p6 }
  0xde   : > { %567 = shalt.err (!%p564_p1)
}
  0xdf   : > { %404 = dma.vmem_to_hbm [thread:$0]  (%p740_p0), %s290_s21, 128, %s287_s16, %s274_s22  }
  0xe0 PF: > { %s301_s6 = sand.u32 1, %s606_s9   ;;  %p835_p8 = scmp.ne.s32.totalorder %s829_s20, 0 }
  0xe1   : > { %p836_p13 = scmp.ge.s32.totalorder %s626_s14, 2  ;;  %s302_s7 = scalar_lea.sflag [#allocation4], %s301_s6 }
  0xe3   : > { %p415_p11 = pnand %p836_p13, %p835_p8 }
  0xe5   : > { %p416_p2 = pneg %p415_p11 }
  0xe7   : > { %601 = dma.done.wait (%p416_p2), %s302_s7, 128  }
  0xe8   : > { %603 = vsyncadd (%p416_p2), %s302_s7, 4294967168  ;;  %s19_s14 = sadd.s32 1, %s626_s14   ;;  %s837_s9 = smov %s610_s10 }
  0xe9   : > { %p16_p12 = scmp.ge.s32.totalorder %s19_s14, 4   ;;  %s838_s10 = smov %s614_s11 }
  0xea   : > { %s839_s11 = smov %s746_s5  ;;  %s840_s12 = smov %s622_s13 }
  0xeb   : > { %s841_s13 = smov %s843_s25  ;;  %18 = sbr.rel (!%p16_p12) target bundleno = 7 (0x7), region = 78 }
  0xf0   :  { %307 = vsyncpa [#allocation3], 1 }
  0xf1   :  { %309 = vsyncpa [#allocation3 + $0x1], 1 }
  0xf2   :  { %310 = vsyncpa [#allocation6], 1 }
  0xf3   :  { %312 = vsyncpa [#allocation6 + $0x1], 1 }
  0xf4   :  { %313 = vsyncpa [#allocation4], 1 }
  0xf5   :  { %315 = vsyncpa [#allocation4 + $0x1], 1 }

</bundles_post_ra>
